<compile_context>
chip_gen: v6e
topology: v6e:2x2x1
jax: 0.10.0
libtpu: 0.0.40
codegen_flags: <defaults>
</compile_context>

<pallas_src>
import jax
import jax.numpy as jnp
from jax.experimental import pallas as pl
from jax.experimental.pallas import tpu as pltpu

LANE = 128
SUBLANE = 8          # f32 sublanes of one vreg; partial sums are (8, 128) f32
CHUNK_ROWS = 512     # in-kernel accumulation chunk (bounds f32 temporaries)


def _round_up(x: int, m: int) -> int:
    return ((x + m - 1) // m) * m


def _sublane_granularity(dtype) -> int:
    """Minimum sublane multiple of a dtype's native packed tile."""
    item = jnp.dtype(dtype).itemsize
    return SUBLANE * max(1, 4 // item)      # 8 for f32, 16 for bf16, 32 for int8/fp8


def _input_vmem_budget_bytes() -> int:
    """VMEM bytes to spend on the two double-buffered input streams."""
    kind = ""
    try:
        kind = jax.devices()[0].device_kind.lower()
    except Exception:
        pass
    if ("v6" in kind) or ("7" in kind):
        # v6e / v7x: 32 MiB scoped-VMEM default -> 16 MiB of input buffers
        # (8192 f32 rows or 16384 bf16 rows per block).
        return 16 << 20
    # v5e (16 MiB scoped-VMEM default) and unknown chips: stay conservative.
    return 8 << 20


def _choose_tiling(rows: int, gran: int, itemsize_sum: int, block_rows_override):
    """Pick (block_rows, chunk_rows) for the streaming grid."""
    if block_rows_override is not None:
        blk = max(gran, _round_up(block_rows_override, gran))
    else:
        budget = _input_vmem_budget_bytes()
        blk = budget // (2 * LANE * itemsize_sum)     # 2 pipeline buffers / input
        blk = max(CHUNK_ROWS, (blk // CHUNK_ROWS) * CHUNK_ROWS)
    blk = min(blk, _round_up(rows, gran))             # never bigger than needed
    if blk > CHUNK_ROWS:
        blk = _round_up(blk, CHUNK_ROWS)              # chunk must divide the block
        chunk = CHUNK_ROWS
    else:
        chunk = blk
    return blk, chunk


def _make_rmse_partial_kernel(rows: int, block_rows: int, chunk_rows: int,
                              needs_mask: bool):
    """Kernel emitting one (8, 128) f32 partial sum of squared diffs per block."""
    num_chunks = block_rows // chunk_rows

    def kernel(o_ref, t_ref, part_ref):

        def sq_sum(masked: bool):
            def body(c, acc):
                r0 = pl.multiple_of(c * chunk_rows, chunk_rows)
                o = o_ref[pl.ds(r0, chunk_rows), :].astype(jnp.float32)
                t = t_ref[pl.ds(r0, chunk_rows), :].astype(jnp.float32)
                d = o - t
                dd = d * d
                if masked:
                    # Rows past the true row count are Pallas-padded garbage;
                    # zero them with a select (safe even if they are NaN/Inf).
                    row0 = pl.program_id(0) * block_rows + r0
                    row_ids = row0 + jax.lax.broadcasted_iota(
                        jnp.int32, (chunk_rows, 1), 0)
                    dd = jnp.where(row_ids < rows, dd, 0.0)
                # Fold the chunk down to one (8, 128) vreg with pure VPU adds
                # (no cross-lane XLU reduction in the hot loop).
                return acc + jnp.sum(
                    dd.reshape(chunk_rows // SUBLANE, SUBLANE, LANE), axis=0)

            init = jnp.zeros((SUBLANE, LANE), jnp.float32)
            return jax.lax.fori_loop(0, num_chunks, body, init)

        if needs_mask:
            # Only the final block extends past the true row count; every
            # other block takes the mask-free path.
            is_last = pl.program_id(0) == pl.num_programs(0) - 1

            @pl.when(jnp.logical_not(is_last))
            def _():
                part_ref[...] = sq_sum(False).reshape(1, SUBLANE, LANE)

            @pl.when(is_last)
            def _():
                part_ref[...] = sq_sum(True).reshape(1, SUBLANE, LANE)
        else:
            part_ref[...] = sq_sum(False).reshape(1, SUBLANE, LANE)

    return kernel


def rmse_loss(output: jax.Array, target: jax.Array, *,
              block_rows: int | None = None) -> jax.Array:
    """Pallas TPU implementation of torch.sqrt(nn.MSELoss()(output, target))."""
    assert output.shape == target.shape, "output/target must have identical shapes"
    n = output.size
    assert n > 0

    # Flatten (free for contiguous arrays); keep native dtype in HBM.
    flat_o = output.reshape(-1)
    flat_t = target.reshape(-1)

    rows = n // LANE
    rem = n - rows * LANE

    # <128-element ragged tail: folded into the tiny host-side finish instead
    # of jnp.pad-ing (re-reading + re-writing) the full arrays in HBM.
    tail_sq = None
    if rem:
        o_tail = flat_o[rows * LANE:].astype(jnp.float32)
        t_tail = flat_t[rows * LANE:].astype(jnp.float32)
        d_tail = o_tail - t_tail
        tail_sq = jnp.sum(d_tail * d_tail)

    if rows == 0:
        # Fewer than 128 elements total: nothing for the kernel to stream.
        return jnp.sqrt(tail_sq / jnp.float32(n))

    o_main = (flat_o[: rows * LANE] if rem else flat_o).reshape(rows, LANE)
    t_main = (flat_t[: rows * LANE] if rem else flat_t).reshape(rows, LANE)

    gran = max(_sublane_granularity(output.dtype),
               _sublane_granularity(target.dtype))
    itemsize_sum = (jnp.dtype(output.dtype).itemsize
                    + jnp.dtype(target.dtype).itemsize)
    blk, chunk = _choose_tiling(rows, gran, itemsize_sum, block_rows)

    grid = pl.cdiv(rows, blk)
    needs_mask = (rows % blk) != 0

    partials = pl.pallas_call(
        _make_rmse_partial_kernel(rows, blk, chunk, needs_mask),
        out_shape=jax.ShapeDtypeStruct((grid, SUBLANE, LANE), jnp.float32),
        grid_spec=pltpu.PrefetchScalarGridSpec(
            num_scalar_prefetch=0,
            grid=(grid,),
            in_specs=[
                pl.BlockSpec((blk, LANE), lambda i: (i, 0)),
                pl.BlockSpec((blk, LANE), lambda i: (i, 0)),
            ],
            # Each grid step owns its own output block -> no carried state,
            # safe to shard the axis across TensorCores.
            out_specs=pl.BlockSpec((1, SUBLANE, LANE), lambda i: (i, 0, 0)),
        ),
        compiler_params=pltpu.CompilerParams(
            # NOTE(v7x): if profiling shows only one TensorCore active, switch
            # this axis to pltpu.CORE_PARALLEL so each TC streams half the rows.
            dimension_semantics=("parallel",),
        ),
    )(o_main, t_main)

    # Tiny finishing reduction (grid * 1024 f32 values + optional tail).
    total = jnp.sum(partials, dtype=jnp.float32)
    if tail_sq is not None:
        total = total + tail_sq
    return jnp.sqrt(total / jnp.float32(n))


if __name__ == "__main__":
    key = jax.random.PRNGKey(0)
    k_out, k_tgt = jax.random.split(key)

    # Small NCHW-style regression output.
    shape = (2, 4, 16, 16)
    output = jax.random.normal(k_out, shape, dtype=jnp.float32)
    target = jax.random.normal(k_tgt, shape, dtype=jnp.float32)

    loss = rmse_loss(output, target)
    jax.block_until_ready(loss)
    ref = jnp.sqrt(jnp.mean((output - target) ** 2))
    assert jnp.allclose(loss, ref, rtol=1e-5, atol=1e-6), (loss, ref)

    # Multi-block "parallel" partial-sum path (force tiny blocks -> grid > 1).
    loss_mb = rmse_loss(output, target, block_rows=8)
    assert jnp.allclose(loss_mb, ref, rtol=1e-5, atol=1e-6), (loss_mb, ref)

    # Native bf16 inputs (kernel upcasts; dtype-aware 16-row sublane tile).
    o_bf = output.astype(jnp.bfloat16)
    t_bf = target.astype(jnp.bfloat16)
    loss_bf = rmse_loss(o_bf, t_bf)
    ref_bf = jnp.sqrt(jnp.mean(
        (o_bf.astype(jnp.float32) - t_bf.astype(jnp.float32)) ** 2))
    assert jnp.allclose(loss_bf, ref_bf, rtol=1e-4, atol=1e-5), (loss_bf, ref_bf)

    # Ragged element count with a 128-aligned prefix: kernel streams the
    # prefix, the 26-element tail is folded into the host-side finish.
    shape_r = (3, 50, 7)   # 1050 = 8*128 + 26
    o_r = jax.random.normal(k_out, shape_r, dtype=jnp.float32)
    t_r = jax.random.normal(k_tgt, shape_r, dtype=jnp.float32)
    loss_r = rmse_loss(o_r, t_r)
    ref_r = jnp.sqrt(jnp.mean((o_r - t_r) ** 2))
    assert jnp.allclose(loss_r, ref_r, rtol=1e-5, atol=1e-6), (loss_r, ref_r)

    # Tiny ragged input (< 128 elements): pure host-side fallback path.
    shape_t = (3, 5, 7)    # 105 elements
    o_t = jax.random.normal(k_out, shape_t, dtype=jnp.float32)
    t_t = jax.random.normal(k_tgt, shape_t, dtype=jnp.float32)
    loss_t = rmse_loss(o_t, t_t)
    ref_t = jnp.sqrt(jnp.mean((o_t - t_t) ** 2))
    assert jnp.allclose(loss_t, ref_t, rtol=1e-5, atol=1e-6), (loss_t, ref_t)

    print("KERNEL_OK")
</pallas_src>

<mosaic_0001>
module attributes {stable_mosaic.version = 11 : i64} {
  func.func @kernel(%arg0: i32, %arg1: memref<16x128xf32, #tpu.memory_space<vmem>>, %arg2: memref<16x128xf32, #tpu.memory_space<vmem>>, %arg3: memref<1x8x128xf32, #tpu.memory_space<vmem>>) attributes {dimension_semantics = [#tpu.dimension_semantics<parallel>], iteration_bounds = array<i64: 1>, scalar_prefetch = 0 : i64, scratch_operands = 0 : i64, tpu.core_type = #tpu.core_type<tc>, window_params = [{transform_indices = @transform_0, window_bounds = array<i64: 16, 128>}, {transform_indices = @transform_1, window_bounds = array<i64: 16, 128>}, {transform_indices = @transform_2, window_bounds = array<i64: 1, 8, 128>}]} {
    %cst = arith.constant 0.000000e+00 : f32
    %0 = vector.broadcast %cst : f32 to vector<8x128xf32>
    %c0_i32 = arith.constant 0 : i32
    %c16_i32 = arith.constant 16 : i32
    %1 = arith.muli %c0_i32, %c16_i32 : i32
    %2 = tpu.assume_multiple %1, 16 : i32
    %3 = arith.index_cast %2 : i32 to index
    %c0 = arith.constant 0 : index
    %4 = vector.load %arg1[%3, %c0] : memref<16x128xf32, #tpu.memory_space<vmem>>, vector<16x128xf32>
    %5 = arith.index_cast %2 : i32 to index
    %c0_0 = arith.constant 0 : index
    %6 = vector.load %arg2[%5, %c0_0] : memref<16x128xf32, #tpu.memory_space<vmem>>, vector<16x128xf32>
    %7 = arith.subf %4, %6 : vector<16x128xf32>
    %8 = arith.mulf %7, %7 : vector<16x128xf32>
    %9 = vector.shape_cast %8 : vector<16x128xf32> to vector<2x8x128xf32>
    %cst_1 = arith.constant dense<0.000000e+00> : vector<8x128xf32>
    %10 = vector.multi_reduction <add>, %9, %cst_1 [0] : vector<2x8x128xf32> to vector<8x128xf32>
    %11 = arith.addf %0, %10 : vector<8x128xf32>
    %c1_i32 = arith.constant 1 : i32
    %12 = vector.shape_cast %11 : vector<8x128xf32> to vector<1x8x128xf32>
    %c0_2 = arith.constant 0 : index
    %c0_3 = arith.constant 0 : index
    %c0_4 = arith.constant 0 : index
    %13 = vector.load %arg3[%c0_2, %c0_3, %c0_4] : memref<1x8x128xf32, #tpu.memory_space<vmem>>, vector<1x8x128xf32>
    tpu.vector_store %arg3[%c0_2, %c0_3, %c0_4], %12 {strides = array<i32>} : memref<1x8x128xf32, #tpu.memory_space<vmem>>, vector<1x8x128xf32>,
    return
  }
  func.func @transform_0(%arg0: i32) -> (i32, i32) {
    %c0_i32 = arith.constant 0 : i32
    %c0_i32_0 = arith.constant 0 : i32
    return %arg0, %c0_i32 : i32, i32
  }
  func.func @transform_1(%arg0: i32) -> (i32, i32) {
    %c0_i32 = arith.constant 0 : i32
    %c0_i32_0 = arith.constant 0 : i32
    return %arg0, %c0_i32 : i32, i32
  }
  func.func @transform_2(%arg0: i32) -> (i32, i32, i32) {
    %c0_i32 = arith.constant 0 : i32
    %c0_i32_0 = arith.constant 0 : i32
    %c0_i32_1 = arith.constant 0 : i32
    return %arg0, %c0_i32, %c0_i32_0 : i32, i32, i32
  }
}

</mosaic_0001>

<bundles_post_ra>
// kernel: tpu_custom_call.1
= control target key start
LH: loop header
LB: loop body
LE: loop exit
PB: predicated region body
PF: predicated region fallthrough
CT: control target
= control target key end

     0   :  { %7 = vsyncpa [#allocation3], 0  ;;  %s167_s0 = inlined_call_operand.hbm [shape: f32[16,128], index: 0, kind: input, shape index: {}]   ;;  %s168_s1 = inlined_call_operand.hbm [shape: f32[16,128], index: 1, kind: input, shape index: {}]   ;;  %s169_s2 = inlined_call_operand.hbm [shape: f32[1,8,128], index: 2, kind: output, shape index: {}]  }
   0x1   :  { %8 = vsyncpa [#allocation6], 0 }
   0x2   :  { %9 = vsyncpa [#allocation4], 0  ;;  %s138_s9 = smov [#allocation2]  }
   0x3   :  { %s15_s10 = sshll.u32 %s138_s9, 4  ;;  %s16_s10 = int_to_ptr.vmem [resolvable:$true] %s15_s10 }
   0x4   :  { %s80_s11 = scalar_lea.vmem %s16_s10, 256  ;;  %p85_p1 = scmp.lt.s32.totalorder %s16_s10, %s16_s10 }
   0x5   :  { %p81_p0 = scmp.ne.s32.totalorder %s16_s10, %s80_s11  ;;  %p86_p2 = scmp.lt.s32.totalorder %s80_s11, %s80_s11 }
   0x7   :  { %p87_p3 = por %p86_p2, %p85_p1 }
   0x9   :  { %p88_p4 = pnand %p87_p3, %p81_p0 }
   0xb   :  { %91 = shalt.err (!%p88_p4)
}
   0xc   :  { %s139_s12 = smov 128   ;;  %s140_s13 = smov 8  }
   0xd   :  { %21 = dma.hbm_to_vmem [thread:$0]  %s167_s0, 256, %s16_s10, [#allocation3], %s139_s12, %s139_s12, %s140_s13  }
   0xe   :  { %s141_s16 = smov [#allocation5]  }
   0xf   :  { %s27_s17 = sshll.u32 %s141_s16, 4  ;;  %s28_s17 = int_to_ptr.vmem [resolvable:$true] %s27_s17 }
  0x10   :  { %s100_s18 = scalar_lea.vmem %s28_s17, 256  ;;  %p105_p6 = scmp.lt.s32.totalorder %s28_s17, %s28_s17 }
  0x11   :  { %p101_p5 = scmp.ne.s32.totalorder %s28_s17, %s100_s18  ;;  %p106_p7 = scmp.lt.s32.totalorder %s100_s18, %s100_s18 }
  0x13   :  { %p107_p8 = por %p106_p7, %p105_p6 }
  0x15   :  { %p108_p9 = pnand %p107_p8, %p101_p5 }
  0x17   :  { %111 = shalt.err (!%p108_p9)
}
  0x18   :  { %33 = dma.hbm_to_vmem [thread:$0]  %s168_s1, 256, %s28_s17, [#allocation6], %s139_s12, %s139_s12, %s140_s13  }
  0x19   :  { %132 = dma.done.wait [#allocation3], 256  }
  0x1a   :  { %133 = vsyncadd [#allocation3], 4294967040 }
  0x1b   :  { %134 = dma.done.wait [#allocation6], 256  }
  0x1c   :  { %135 = vsyncadd [#allocation6], 4294967040  ;;  %v40_v0 = vld [vmem:[#allocation2] sm:$0xff]  ;;  %v41_v1 = vld [vmem:[#allocation2 + $0x8] sm:$0xff]  ;;  %s142_s0 = smov [#allocation7]  }
  0x1d   :  { %v42_v2 = vld [vmem:[#allocation5] sm:$0xff]  ;;  %v43_v3 = vld [vmem:[#allocation5 + $0x8] sm:$0xff]  ;;  %s57_s21 = sshll.u32 %s142_s0, 4  ;;  %s58_s21 = int_to_ptr.vmem [resolvable:$true] %s57_s21 }
  0x1e   :  { %v44_v4 = vsub.f32 %v40_v0, %v42_v2  ;;  %v45_v5 = vsub.f32 %v41_v1, %v43_v3  ;;  %s112_s22 = scalar_lea.vmem %s58_s21, 128  ;;  %p117_p11 = scmp.lt.s32.totalorder %s58_s21, %s58_s21 }
  0x1f   :  { %p113_p10 = scmp.ne.s32.totalorder %s58_s21, %s112_s22  ;;  %p118_p12 = scmp.lt.s32.totalorder %s112_s22, %s112_s22 }
  0x20   :  { %v46_v6 = vmul.f32 %v44_v4, %v44_v4  ;;  %v47_v7 = vmul.f32 %v45_v5, %v45_v5 }
  0x21   :  { %p119_p13 = por %p118_p12, %p117_p11 }
  0x22   :  { %v48_v8 = vadd.f32 %v47_v7, %v46_v6 }
  0x23   :  { %p120_p0 = pnand %p119_p13, %p113_p10 }
  0x24   :  { %50 = vst [vmem:[#allocation7] sm:$0xff] %v48_v8 }
  0x25   :  { %123 = shalt.err (!%p120_p0)
}
  0x26   :  { %60 = dma.vmem_to_hbm [thread:$0]  %s58_s21, 128, %s169_s2, [#allocation4]  }
  0x27   :  { %136 = dma.done.wait [#allocation4], 128  }
  0x28   :  { %137 = vsyncadd [#allocation4], 4294967168 }
  0x29   :  { %64 = vsyncpa [#allocation3], 1 }
  0x2a   :  { %65 = vsyncpa [#allocation6], 1 }
  0x2b   :  { %66 = vsyncpa [#allocation4], 1 }

</bundles_post_ra>
